<compile_context>
chip_gen: v5e
topology: v5e:2x2
jax: 0.10.0
libtpu: 0.0.40
codegen_flags: <defaults>
</compile_context>

<pallas_src>
import jax
import jax.numpy as jnp
from jax.experimental import pallas as pl
from jax.experimental.pallas import tpu as pltpu

_LANE = 128      # hidden (kernel-internal) feature dims padded to this
_SUBLANE = 8     # batch tiles must be a multiple of this


def _round_up(n, m):
    return ((n + m - 1) // m) * m


def _cdiv(a, b):
    return (a + b - 1) // b


# --------------------------------------------------------------------------
# Kernel: whole forward pass fused, one batch tile per grid step.
# --------------------------------------------------------------------------
def _autoencoder_kernel(x_ref,
                        w1_ref, b1_ref,
                        w2_ref, b2_ref,
                        w3_ref, b3_ref,
                        w4_ref, b4_ref,
                        y_ref):
    mxu_dt = w1_ref.dtype  # f32 or bf16 — MXU input dtype chosen at prep time

    def dense(h, w_ref, b_ref):
        # MXU matmul with f32 accumulation; bias add / ReLU stay in f32 (VPU).
        return jnp.dot(h.astype(mxu_dt), w_ref[...],
                       preferred_element_type=jnp.float32) + b_ref[...]

    h = jnp.maximum(dense(x_ref[...], w1_ref, b1_ref), 0.0)
    h = jnp.maximum(dense(h, w2_ref, b2_ref), 0.0)
    h = jnp.maximum(dense(h, w3_ref, b3_ref), 0.0)
    y = dense(h, w4_ref, b4_ref)
    y_ref[...] = y.astype(y_ref.dtype)


# --------------------------------------------------------------------------
# One-time parameter prep: transpose to (in, out); pad only the hidden
# (kernel-internal) dims to a multiple of 128; input_dim / output_dim stay at
# their true widths so the x / y DMAs carry no padding.  Biases stay f32.
# --------------------------------------------------------------------------
def prepare_params(params, *, mxu_dtype=jnp.bfloat16):
    def prep(w, b, pad_in, pad_out):
        out_d, in_d = w.shape                     # PyTorch convention (out, in)
        in_p = _round_up(in_d, _LANE) if pad_in else in_d
        out_p = _round_up(out_d, _LANE) if pad_out else out_d
        wt = jnp.zeros((in_p, out_p), mxu_dtype)
        wt = wt.at[:in_d, :out_d].set(w.T.astype(mxu_dtype))
        bp = jnp.zeros((1, out_p), jnp.float32)
        bp = bp.at[0, :out_d].set(b.astype(jnp.float32))
        return wt, bp

    w1, b1 = prep(params["w1"], params["b1"], pad_in=False, pad_out=True)
    w2, b2 = prep(params["w2"], params["b2"], pad_in=True, pad_out=True)
    w3, b3 = prep(params["w3"], params["b3"], pad_in=True, pad_out=True)
    w4, b4 = prep(params["w4"], params["b4"], pad_in=True, pad_out=False)
    return dict(
        w1=w1, b1=b1, w2=w2, b2=b2, w3=w3, b3=b3, w4=w4, b4=b4,
        input_dim=int(params["w1"].shape[1]),
        output_dim=int(params["w4"].shape[0]),
    )


# --------------------------------------------------------------------------
# Wrapper: balanced batch tiling, >=2 grid steps for v7x megacore, fused call.
# --------------------------------------------------------------------------
def autoencoder_forward(x, prepped, *, tile_b=1024):
    B, in_dim = x.shape
    assert in_dim == prepped["input_dim"]
    out_dim = prepped["output_dim"]
    out_dtype = x.dtype   # bf16 in -> bf16 out (halves y DMA on the bf16 path)

    # ---- batch tiling: balanced tiles, sublane-rounded, >=2 steps if B>=16 --
    tile_b = max(tile_b, _SUBLANE)
    n_tiles = max(1, _cdiv(B, tile_b))
    if B >= 2 * _SUBLANE and n_tiles < 2:
        n_tiles = 2                                # shard batch over both v7x TCs
    tb = _round_up(_cdiv(B, n_tiles), _SUBLANE)
    Bp = n_tiles * tb

    xp = x if Bp == B else jnp.zeros((Bp, in_dim), x.dtype).at[:B, :].set(x)

    weights = [prepped[k] for k in ("w1", "w2", "w3", "w4")]
    biases = [prepped[k] for k in ("b1", "b2", "b3", "b4")]
    param_bytes = sum(a.size * a.dtype.itemsize for a in weights + biases)

    h1p = prepped["w1"].shape[1]
    h2p = prepped["w2"].shape[1]
    h3p = prepped["w3"].shape[1]
    flops = 2 * Bp * (in_dim * h1p + h1p * h2p + h2p * h3p + h3p * out_dim)
    bytes_accessed = (xp.size * xp.dtype.itemsize
                      + Bp * out_dim * jnp.dtype(out_dtype).itemsize
                      + param_bytes)
    cost = pl.CostEstimate(flops=flops, transcendentals=0,
                           bytes_accessed=bytes_accessed)

    # VMEM budget: double-buffered x / y tiles + resident params (default
    # double-buffered) + headroom for compiler scratch.  Cap at v7x physical.
    vmem_needed = (2 * tb * in_dim * xp.dtype.itemsize
                   + 2 * tb * out_dim * jnp.dtype(out_dtype).itemsize
                   + 2 * param_bytes)
    vmem_limit = int(min(64 * 1024 * 1024, vmem_needed + (8 << 20)))

    def full(a):
        return pl.BlockSpec(a.shape, lambda i: (0, 0))

    y = pl.pallas_call(
        _autoencoder_kernel,
        out_shape=jax.ShapeDtypeStruct((Bp, out_dim), out_dtype),
        grid_spec=pltpu.PrefetchScalarGridSpec(
            num_scalar_prefetch=0,
            grid=(n_tiles,),
            in_specs=[
                pl.BlockSpec((tb, in_dim), lambda i: (i, 0)),   # x batch tile
                full(prepped["w1"]), full(prepped["b1"]),
                full(prepped["w2"]), full(prepped["b2"]),
                full(prepped["w3"]), full(prepped["b3"]),
                full(prepped["w4"]), full(prepped["b4"]),
            ],
            out_specs=pl.BlockSpec((tb, out_dim), lambda i: (i, 0)),
        ),
        compiler_params=pltpu.CompilerParams(
            dimension_semantics=("parallel",),   # megacore-shard batch on v7x
            vmem_limit_bytes=vmem_limit),
        cost_estimate=cost,
    )(xp, prepped["w1"], prepped["b1"], prepped["w2"], prepped["b2"],
      prepped["w3"], prepped["b3"], prepped["w4"], prepped["b4"])

    return y if Bp == B else y[:B]


# --------------------------------------------------------------------------
# Reference + init (PyTorch-convention params).
# --------------------------------------------------------------------------
def init_params(key, input_dim, output_dim, n_hid, n_bottleneck):
    """Deterministic init mimicking nn.Linear's U(-1/sqrt(fan_in), 1/sqrt(fan_in))."""
    def linear(k, fan_in, fan_out):
        kw, kb = jax.random.split(k)
        bound = 1.0 / jnp.sqrt(fan_in)
        w = jax.random.uniform(kw, (fan_out, fan_in), jnp.float32, -bound, bound)
        b = jax.random.uniform(kb, (fan_out,), jnp.float32, -bound, bound)
        return w, b

    k1, k2, k3, k4 = jax.random.split(key, 4)
    w1, b1 = linear(k1, input_dim, n_hid)
    w2, b2 = linear(k2, n_hid, n_bottleneck)
    w3, b3 = linear(k3, n_bottleneck, n_hid)
    w4, b4 = linear(k4, n_hid, output_dim)
    return dict(w1=w1, b1=b1, w2=w2, b2=b2, w3=w3, b3=b3, w4=w4, b4=b4)


def reference_forward(x, p):
    """Pure-JAX reference replicating the PyTorch forward exactly."""
    h = jnp.maximum(x @ p["w1"].T + p["b1"], 0.0)
    h = jnp.maximum(h @ p["w2"].T + p["b2"], 0.0)
    h = jnp.maximum(h @ p["w3"].T + p["b3"], 0.0)
    return h @ p["w4"].T + p["b4"]


if __name__ == "__main__":
    # Small shapes consistent with the module.
    B, input_dim, n_hid, n_bottleneck, output_dim = 16, 64, 32, 16, 64

    key = jax.random.PRNGKey(0)
    kx, kp = jax.random.split(key)
    x = jax.random.normal(kx, (B, input_dim), jnp.float32)
    params = init_params(kp, input_dim, output_dim, n_hid, n_bottleneck)
    y_ref = reference_forward(x, params)

    # --- default path: bf16 MXU inputs, f32 accumulation / elementwise ------
    prepped = prepare_params(params)                      # bf16 weights
    fwd = jax.jit(lambda xi: autoencoder_forward(xi, prepped))
    y = jax.block_until_ready(fwd(x))
    assert y.shape == (B, output_dim)
    assert jnp.allclose(y, y_ref, atol=5e-2, rtol=5e-2), "bf16-weight mismatch"

    # --- f32-weight path (tolerance loosened: TPU MXU f32 dots use pass
    #     decomposition at default precision, so bit-level match is not
    #     guaranteed across generations) ------------------------------------
    prepped_f32 = prepare_params(params, mxu_dtype=jnp.float32)
    fwd_f32 = jax.jit(lambda xi: autoencoder_forward(xi, prepped_f32))
    y32 = jax.block_until_ready(fwd_f32(x))
    assert y32.shape == (B, output_dim)
    assert jnp.allclose(y32, y_ref, atol=1e-3, rtol=1e-3), "f32-weight mismatch"

    # --- bf16 activations end-to-end (halves x / y DMA bytes) ---------------
    x_bf16 = x.astype(jnp.bfloat16)
    y_bf16 = jax.block_until_ready(fwd(x_bf16))
    assert y_bf16.shape == (B, output_dim)
    assert y_bf16.dtype == jnp.bfloat16
    assert jnp.allclose(y_bf16.astype(jnp.float32), y_ref,
                        atol=7e-2, rtol=7e-2), "bf16-activation mismatch"

    # TODO(synk): the module's `print(type(x.data))` debug side-effect and the
    # `get_features` stub (returns None) are intentionally not reproduced.
    print("KERNEL_OK")
</pallas_src>

<mosaic_0001>
module attributes {stable_mosaic.version = 11 : i64} {
  func.func @_autoencoder_kernel(%arg0: i32, %arg1: memref<8x64xf32, #tpu.memory_space<vmem>>, %arg2: memref<64x128xbf16, #tpu.memory_space<vmem>>, %arg3: memref<1x128xf32, #tpu.memory_space<vmem>>, %arg4: memref<128x128xbf16, #tpu.memory_space<vmem>>, %arg5: memref<1x128xf32, #tpu.memory_space<vmem>>, %arg6: memref<128x128xbf16, #tpu.memory_space<vmem>>, %arg7: memref<1x128xf32, #tpu.memory_space<vmem>>, %arg8: memref<128x64xbf16, #tpu.memory_space<vmem>>, %arg9: memref<1x64xf32, #tpu.memory_space<vmem>>, %arg10: memref<8x64xf32, #tpu.memory_space<vmem>>) attributes {dimension_semantics = [#tpu.dimension_semantics<parallel>], iteration_bounds = array<i64: 2>, scalar_prefetch = 0 : i64, scratch_operands = 0 : i64, tpu.core_type = #tpu.core_type<tc>, window_params = [{transform_indices = @transform_0, window_bounds = array<i64: 8, 64>}, {pipeline_mode = #tpu.pipeline_mode<synchronous>, transform_indices = @transform_1, window_bounds = array<i64: 64, 128>}, {pipeline_mode = #tpu.pipeline_mode<synchronous>, transform_indices = @transform_2, window_bounds = array<i64: 1, 128>}, {pipeline_mode = #tpu.pipeline_mode<synchronous>, transform_indices = @transform_3, window_bounds = array<i64: 128, 128>}, {pipeline_mode = #tpu.pipeline_mode<synchronous>, transform_indices = @transform_4, window_bounds = array<i64: 1, 128>}, {pipeline_mode = #tpu.pipeline_mode<synchronous>, transform_indices = @transform_5, window_bounds = array<i64: 128, 128>}, {pipeline_mode = #tpu.pipeline_mode<synchronous>, transform_indices = @transform_6, window_bounds = array<i64: 1, 128>}, {pipeline_mode = #tpu.pipeline_mode<synchronous>, transform_indices = @transform_7, window_bounds = array<i64: 128, 64>}, {pipeline_mode = #tpu.pipeline_mode<synchronous>, transform_indices = @transform_8, window_bounds = array<i64: 1, 64>}, {transform_indices = @transform_9, window_bounds = array<i64: 8, 64>}]} {
    %c0 = arith.constant 0 : index
    %c0_0 = arith.constant 0 : index
    %0 = vector.load %arg1[%c0, %c0_0] : memref<8x64xf32, #tpu.memory_space<vmem>>, vector<8x64xf32>
    %1 = arith.truncf %0 : vector<8x64xf32> to vector<8x64xbf16>
    %c0_1 = arith.constant 0 : index
    %c0_2 = arith.constant 0 : index
    %2 = vector.load %arg2[%c0_1, %c0_2] : memref<64x128xbf16, #tpu.memory_space<vmem>>, vector<64x128xbf16>
    %cst = arith.constant dense<0.000000e+00> : vector<8x128xf32>
    %3 = tpu.matmul %1, %2, %cst {dimension_numbers = #tpu.dot_dimension_numbers<[1], [0], [0], [1], [0, 0, 1, 1], [], []>} : vector<8x64xbf16>, vector<64x128xbf16>, vector<8x128xf32> -> vector<8x128xf32>
    %c0_3 = arith.constant 0 : index
    %c0_4 = arith.constant 0 : index
    %4 = vector.load %arg3[%c0_3, %c0_4] : memref<1x128xf32, #tpu.memory_space<vmem>>, vector<1x128xf32>
    %5 = vector.broadcast %4 : vector<1x128xf32> to vector<8x128xf32>
    %6 = arith.addf %3, %5 : vector<8x128xf32>
    %cst_5 = arith.constant 0.000000e+00 : f32
    %7 = vector.broadcast %cst_5 : f32 to vector<8x128xf32>
    %8 = arith.maximumf %6, %7 : vector<8x128xf32>
    %9 = arith.truncf %8 : vector<8x128xf32> to vector<8x128xbf16>
    %c0_6 = arith.constant 0 : index
    %c0_7 = arith.constant 0 : index
    %10 = vector.load %arg4[%c0_6, %c0_7] : memref<128x128xbf16, #tpu.memory_space<vmem>>, vector<128x128xbf16>
    %cst_8 = arith.constant dense<0.000000e+00> : vector<8x128xf32>
    %11 = tpu.matmul %9, %10, %cst_8 {dimension_numbers = #tpu.dot_dimension_numbers<[1], [0], [0], [1], [0, 0, 1, 1], [], []>} : vector<8x128xbf16>, vector<128x128xbf16>, vector<8x128xf32> -> vector<8x128xf32>
    %c0_9 = arith.constant 0 : index
    %c0_10 = arith.constant 0 : index
    %12 = vector.load %arg5[%c0_9, %c0_10] : memref<1x128xf32, #tpu.memory_space<vmem>>, vector<1x128xf32>
    %13 = vector.broadcast %12 : vector<1x128xf32> to vector<8x128xf32>
    %14 = arith.addf %11, %13 : vector<8x128xf32>
    %cst_11 = arith.constant 0.000000e+00 : f32
    %15 = vector.broadcast %cst_11 : f32 to vector<8x128xf32>
    %16 = arith.maximumf %14, %15 : vector<8x128xf32>
    %17 = arith.truncf %16 : vector<8x128xf32> to vector<8x128xbf16>
    %c0_12 = arith.constant 0 : index
    %c0_13 = arith.constant 0 : index
    %18 = vector.load %arg6[%c0_12, %c0_13] : memref<128x128xbf16, #tpu.memory_space<vmem>>, vector<128x128xbf16>
    %cst_14 = arith.constant dense<0.000000e+00> : vector<8x128xf32>
    %19 = tpu.matmul %17, %18, %cst_14 {dimension_numbers = #tpu.dot_dimension_numbers<[1], [0], [0], [1], [0, 0, 1, 1], [], []>} : vector<8x128xbf16>, vector<128x128xbf16>, vector<8x128xf32> -> vector<8x128xf32>
    %c0_15 = arith.constant 0 : index
    %c0_16 = arith.constant 0 : index
    %20 = vector.load %arg7[%c0_15, %c0_16] : memref<1x128xf32, #tpu.memory_space<vmem>>, vector<1x128xf32>
    %21 = vector.broadcast %20 : vector<1x128xf32> to vector<8x128xf32>
    %22 = arith.addf %19, %21 : vector<8x128xf32>
    %cst_17 = arith.constant 0.000000e+00 : f32
    %23 = vector.broadcast %cst_17 : f32 to vector<8x128xf32>
    %24 = arith.maximumf %22, %23 : vector<8x128xf32>
    %25 = arith.truncf %24 : vector<8x128xf32> to vector<8x128xbf16>
    %c0_18 = arith.constant 0 : index
    %c0_19 = arith.constant 0 : index
    %26 = vector.load %arg8[%c0_18, %c0_19] : memref<128x64xbf16, #tpu.memory_space<vmem>>, vector<128x64xbf16>
    %cst_20 = arith.constant dense<0.000000e+00> : vector<8x64xf32>
    %27 = tpu.matmul %25, %26, %cst_20 {dimension_numbers = #tpu.dot_dimension_numbers<[1], [0], [0], [1], [0, 0, 1, 1], [], []>} : vector<8x128xbf16>, vector<128x64xbf16>, vector<8x64xf32> -> vector<8x64xf32>
    %c0_21 = arith.constant 0 : index
    %c0_22 = arith.constant 0 : index
    %28 = vector.load %arg9[%c0_21, %c0_22] : memref<1x64xf32, #tpu.memory_space<vmem>>, vector<1x64xf32>
    %29 = vector.broadcast %28 : vector<1x64xf32> to vector<8x64xf32>
    %30 = arith.addf %27, %29 : vector<8x64xf32>
    %c0_23 = arith.constant 0 : index
    %c0_24 = arith.constant 0 : index
    %31 = vector.load %arg10[%c0_23, %c0_24] : memref<8x64xf32, #tpu.memory_space<vmem>>, vector<8x64xf32>
    tpu.vector_store %arg10[%c0_23, %c0_24], %30 {strides = array<i32>} : memref<8x64xf32, #tpu.memory_space<vmem>>, vector<8x64xf32>,
    return
  }
  func.func @transform_0(%arg0: i32) -> (i32, i32) {
    %c0_i32 = arith.constant 0 : i32
    %c0_i32_0 = arith.constant 0 : i32
    return %arg0, %c0_i32 : i32, i32
  }
  func.func @transform_1(%arg0: i32) -> (i32, i32) {
    %c0_i32 = arith.constant 0 : i32
    %c0_i32_0 = arith.constant 0 : i32
    %c0_i32_1 = arith.constant 0 : i32
    return %c0_i32, %c0_i32_0 : i32, i32
  }
  func.func @transform_2(%arg0: i32) -> (i32, i32) {
    %c0_i32 = arith.constant 0 : i32
    %c0_i32_0 = arith.constant 0 : i32
    %c0_i32_1 = arith.constant 0 : i32
    return %c0_i32, %c0_i32_0 : i32, i32
  }
  func.func @transform_3(%arg0: i32) -> (i32, i32) {
    %c0_i32 = arith.constant 0 : i32
    %c0_i32_0 = arith.constant 0 : i32
    %c0_i32_1 = arith.constant 0 : i32
    return %c0_i32, %c0_i32_0 : i32, i32
  }
  func.func @transform_4(%arg0: i32) -> (i32, i32) {
    %c0_i32 = arith.constant 0 : i32
    %c0_i32_0 = arith.constant 0 : i32
    %c0_i32_1 = arith.constant 0 : i32
    return %c0_i32, %c0_i32_0 : i32, i32
  }
  func.func @transform_5(%arg0: i32) -> (i32, i32) {
    %c0_i32 = arith.constant 0 : i32
    %c0_i32_0 = arith.constant 0 : i32
    %c0_i32_1 = arith.constant 0 : i32
    return %c0_i32, %c0_i32_0 : i32, i32
  }
  func.func @transform_6(%arg0: i32) -> (i32, i32) {
    %c0_i32 = arith.constant 0 : i32
    %c0_i32_0 = arith.constant 0 : i32
    %c0_i32_1 = arith.constant 0 : i32
    return %c0_i32, %c0_i32_0 : i32, i32
  }
  func.func @transform_7(%arg0: i32) -> (i32, i32) {
    %c0_i32 = arith.constant 0 : i32
    %c0_i32_0 = arith.constant 0 : i32
    %c0_i32_1 = arith.constant 0 : i32
    return %c0_i32, %c0_i32_0 : i32, i32
  }
  func.func @transform_8(%arg0: i32) -> (i32, i32) {
    %c0_i32 = arith.constant 0 : i32
    %c0_i32_0 = arith.constant 0 : i32
    %c0_i32_1 = arith.constant 0 : i32
    return %c0_i32, %c0_i32_0 : i32, i32
  }
  func.func @transform_9(%arg0: i32) -> (i32, i32) {
    %c0_i32 = arith.constant 0 : i32
    %c0_i32_0 = arith.constant 0 : i32
    return %arg0, %c0_i32 : i32, i32
  }
}

</mosaic_0001>

<bundles_post_ra>
// kernel: _lambda_.1
= control target key start
LH: loop header
LB: loop body
LE: loop exit
PB: predicated region body
PF: predicated region fallthrough
CT: control target
= control target key end

     0   :  { %s1639_s0 = inlined_call_operand.hbm [shape: f32[16,64], index: 0, kind: input, shape index: {}]   ;;  %s1640_s1 = inlined_call_operand.hbm [shape: bf16[64,128], index: 1, kind: input, shape index: {}]   ;;  %s1641_s2 = inlined_call_operand.hbm [shape: f32[1,128], index: 2, kind: input, shape index: {}]   ;;  %s1642_s3 = inlined_call_operand.hbm [shape: bf16[128,128], index: 3, kind: input, shape index: {}]   ;;  %s1643_s4 = inlined_call_operand.vmem [shape: f32[1,128], index: 4, kind: input, shape index: {}]   ;;  %s1644_s5 = inlined_call_operand.hbm [shape: bf16[128,128], index: 5, kind: input, shape index: {}]   ;;  %s1645_s6 = inlined_call_operand.vmem [shape: f32[1,128], index: 6, kind: input, shape index: {}]   ;;  %s1646_s7 = inlined_call_operand.hbm [shape: bf16[128,64], index: 7, kind: input, shape index: {}]   ;;  %s1647_s8 = inlined_call_operand.vmem [shape: f32[1,64], index: 8, kind: input, shape index: {}]   ;;  %s1648_s9 = inlined_call_operand.hbm [shape: f32[16,64], index: 9, kind: output, shape index: {}]  }
   0x1   :  { %1649 = sst [smem:[#allocation19_spill]] %s1640_s1 }
   0x2   :  { %1650 = sst [smem:[#allocation20_spill]] %s1641_s2 }
   0x3   :  { %1651 = sst [smem:[#allocation21_spill]] %s1642_s3 }
   0x4   :  { %14 = vsyncpa [#allocation3], 0 }
   0x5   :  { %16 = vsyncpa [#allocation3 + $0x1], 0 }
   0x6   :  { %17 = vsyncpa [#allocation6], 0 }
   0x7   :  { %18 = vsyncpa [#allocation9], 0 }
   0x8   :  { %19 = vsyncpa [#allocation12], 0 }
   0x9   :  { %20 = vsyncpa [#allocation4], 0 }
   0xa   :  { %22 = vsyncpa [#allocation4 + $0x1], 0  ;;  %s1454_s30 = smov 0   ;;  %s1456_s10 = smov 0  }
   0xb   :  { %s1458_s11 = smov 0   ;;  %s1460_s12 = smov 0  }
   0xc LB: > { %s1652_s1 = sld [smem:[#allocation19_spill]]  ;;  %s1478_s16 = sadd.s32 4294967295, %s1395_s12   ;;  %s1395_s12 = sphi %s1460_s12, %s1665_s12   ;;  %s1391_s11 = sphi %s1458_s11, %s1664_s11   ;;  %s1387_s10 = sphi %s1456_s10, %s1663_s10   ;;  %s1383_s30 = sphi %s1454_s30, %s1662_s30  }
   0xd   : > { %p872_p0 = scmp.ge.s32.totalorder %s1395_s12, 1  ;;  %p49_p1 = scmp.eq.s32.totalorder %s1478_s16, 0 }
   0xe   : > { %p253_p2 = scmp.lt.s32.totalorder %s1395_s12, 3  ;;  %s1397_s18 = smov [#allocation5]  }
   0xf   : > { %s266_s19 = sshll.u32 %s1397_s18, 4  ;;  %s1654_s3 = sld [smem:[#allocation21_spill]]  ;;  %s267_s19 = int_to_ptr.vmem [resolvable:$true] %s266_s19 }
  0x10   : > { %p1483_p3 = pnand %p872_p0, %p253_p2  ;;  %s1656_s2 = sld [smem:[#allocation20_spill]] }
  0x11   : > { %s1398_s27 = smov [#allocation8]   ;;  %s1399_s29 = smov 64  }
  0x12   : > { %s264_s15 = sshll.u32 %s1652_s1, 4  ;;  %p1058_p4 = pneg %p1483_p3  ;;  %s265_s15 = int_to_ptr.hbm [resolvable:$true] %s264_s15 }
  0x13   : > { %s292_s28 = sshll.u32 %s1398_s27, 4  ;;  %s1400_s13 = smov 4   ;;  %s293_s28 = int_to_ptr.vmem [resolvable:$true] %s292_s28 }
  0x14   : > { %p1495_p6 = pnand %p1058_p4, %p49_p1  ;;  %s307_s20 = sshll.u32 %s1644_s5, 4  ;;  %s308_s20 = int_to_ptr.hbm [resolvable:$true] %s307_s20 }
  0x15   : > { %s290_s22 = sshll.u32 %s1654_s3, 4  ;;  %s1401_s21 = smov [#allocation7]   ;;  %s291_s22 = int_to_ptr.hbm [resolvable:$true] %s290_s22 }
  0x16   : > { %s279_s26 = sshll.u32 %s1656_s2, 4  ;;  %s281_s24 = sshll.u32 %s1401_s21, 4  ;;  %s280_s26 = int_to_ptr.hbm [resolvable:$true] %s279_s26  ;;  %s282_s24 = int_to_ptr.vmem [resolvable:$true] %s281_s24 }
  0x17   : > { %1061 = dma.hbm_to_vmem [thread:$0]  (!%p1495_p6), %s265_s15, 512, %s267_s19, [#allocation6], %s1399_s29, %s1399_s29, %s1400_s13  }
  0x18   : > { %1067 = dma.hbm_to_vmem [thread:$0]  (!%p1495_p6), %s291_s22, 1024, %s293_s28, [#allocation9], %s1399_s29, %s1399_s29, %s1400_s13  }
  0x19   : > { %1064 = dma.hbm_to_vmem [thread:$0]  (!%p1495_p6), %s280_s26, 16, %s282_s24, [#allocation6]  }
  0x1a   : > { %s1402_s15 = smov [#allocation10]   ;;  %s324_s27 = sshll.u32 %s1646_s7, 4  ;;  %s325_s27 = int_to_ptr.hbm [resolvable:$true] %s324_s27 }
  0x1b   : > { %s309_s19 = sshll.u32 %s1402_s15, 4  ;;  %s1403_s28 = smov [#allocation11]   ;;  %s310_s19 = int_to_ptr.vmem [resolvable:$true] %s309_s19 }
  0x1c   : > { %1070 = dma.hbm_to_vmem [thread:$0]  (!%p1495_p6), %s308_s20, 1024, %s310_s19, [#allocation9], %s1399_s29, %s1399_s29, %s1400_s13  }
  0x1d   : > { %s326_s14 = sshll.u32 %s1403_s28, 4  ;;  %s871_s26 = sadd.s32 4294967294, %s1395_s12   ;;  %s327_s14 = int_to_ptr.vmem [resolvable:$true] %s326_s14 }
  0x1e   : > { %1073 = dma.hbm_to_vmem [thread:$0]  (!%p1495_p6), %s325_s27, 1024, %s327_s14, [#allocation12], %s1399_s29, %s1399_s29, %s1400_s13  }
  0x1f   : > { %s1520_s18 = sadd.s32 1, %s1395_s12   ;;  %s35_s21 = sadd.s32 1, %s1391_s11 }
  0x20   : > { %s32_s24 = ssub.s32 %s1395_s12, %s1520_s18  ;;  %p42_p7 = scmp.ne.s32.totalorder %s1391_s11, %s1387_s10 }
  0x21   : > { %p33_p8 = scmp.eq.s32.totalorder %s32_s24, 0  ;;  %p43_p9 = scmp.eq.s32.totalorder %s1395_s12, 0 }
  0x22   : > { %p48_p10 = scmp.ne.s32.totalorder %s1387_s10, %s1383_s30  ;;  %p240_p11 = scmp.eq.s32.totalorder %s1478_s16, 1 }
  0x23   : > { %s1532_s20 = scalar_select %p33_p8, %s1391_s11, %s35_s21  }
  0x24   : > { %p1536_p12 = por %p49_p1, %p48_p10  ;;  %p1540_p13 = por %p240_p11, %p42_p7 }
  0x25   : > { %p246_p0 = scmp.eq.s32.totalorder %s871_s26, 1  ;;  %p44_p2 = por %p43_p9, %p42_p7 }
  0x26   : > { %s343_s13 = sand.u32 1, %s1391_s11   ;;  %p1087_p6 = scmp.lt.s32.totalorder %s1395_s12, 2 }
  0x27   : > { %p1545_p4 = por %p246_p0, %p48_p10  ;;  %s879_s19 = sshll.u32 %s343_s13, 3 }
  0x28   : > { %s880_s22 = sshll.u32 %s1395_s12, 3  ;;  %s347_s21 = scalar_lea.vmem [#allocation2], %s879_s19 }
  0x29   : > { %s351_s28 = scalar_lea.hbm %s1639_s0, %s880_s22  ;;  %s355_s24 = sshll.u32 %s347_s21, 4  ;;  %s356_s24 = int_to_ptr.vmem [resolvable:$true] %s355_s24 }
  0x2a   : > { %s353_s14 = sshll.u32 %s351_s28, 4  ;;  %p1554_p8 = pnand %p1087_p6, %p44_p2  ;;  %s354_s14 = int_to_ptr.hbm [resolvable:$true] %s353_s14 }
  0x2b   : > { %s344_s1 = scalar_lea.sflag [#allocation3], %s343_s13  ;;  %s1287_s2 = sshra.s32 %s354_s14, 4  ;;  %s1288_s2 = int_to_ptr.hbm [resolvable:$true] %s1287_s2 }
  0x2c   : > { %s1289_s3 = scalar_lea.hbm %s1288_s2, 8  ;;  %p1291_p9 = pneg %p1554_p8 }
  0x2d   : > { %p1290_p7 = scmp.ne.s32.totalorder %s1288_s2, %s1289_s3  ;;  %s1294_s19 = scalar_lea.hbm %s1639_s0, 16 }
  0x2e   : > { %p1295_p0 = scmp.lt.s32.totalorder %s1288_s2, %s1639_s0  ;;  %p1296_p2 = scmp.lt.s32.totalorder %s1294_s19, %s1289_s3 }
  0x2f   : > { %p1292_p10 = pnand %p1291_p9, %p1290_p7 }
  0x30   : > { %p1297_p6 = por %p1296_p2, %p1295_p0 }
  0x31   : > { %p1293_p11 = pneg %p1292_p10 }
  0x33   : > { %p1298_p5 = pnand %p1297_p6, %p1293_p11 }
  0x35   : > { %1301 = shalt.err (!%p1298_p5)
}
  0x36   : > { %1077 = dma.hbm_to_vmem [thread:$0]  (!%p1554_p8), %s354_s14, 128, %s356_s24, %s344_s1  }
  0x37   : > { %364 = sbr.rel (%p1483_p3) target bundleno = 625 (0x271), region = 56  ;;  %s1571_s13 = sand.u32 (!%p1483_p3), 1, %s1387_s10  }
  0x38   : > { %s882_s21 = sshll.u32 (!%p1483_p3), %s1571_s13, 3  ;;  %s367_s22 = scalar_lea.sflag (!%p1483_p3), [#allocation3], %s1571_s13 }
  0x39   : > { %s370_s2 = scalar_lea.vmem (!%p1483_p3), [#allocation2], %s882_s21 }
  0x3c   : > { %1362 = dma.done.wait (%p1536_p12), %s367_s22, 128  }
  0x3d   : > { %1364 = vsyncadd (%p1536_p12), %s367_s22, 4294967168 }
  0x3e   : > { %1366 = dma.done.wait (%p49_p1), [#allocation6], 528  }
  0x3f   : > { %1368 = vsyncadd (%p49_p1), [#allocation6], 4294966768 }
  0x40   : > { %1370 = dma.done.wait (%p49_p1), [#allocation9], 2048  }
  0x41   : > { %1372 = vsyncadd (%p49_p1), [#allocation9], 4294965248 }
  0x42   : > { %1374 = dma.done.wait (%p49_p1), [#allocation12], 1024  }
  0x43   : > { %1376 = vsyncadd (%p49_p1), [#allocation12], 4294966272  ;;  %v1009_v0 = vld [vmem:[#allocation5 + $0x18] sm:$0xff]  ;;  %v1008_v2 = vld [vmem:[#allocation5 + $0x10] sm:$0xff]  ;;  %vm470_vm0 = vcmask 523264   ;;  %s1003_s14 = sshll.u32 %s1478_s16, 3 }
  0x44   : > { %v1017_v1 = vld [vmem:[#allocation8 + $0x38] sm:$0xff]  ;;  %478 = vmatpush.bf16.msra.mxu0 %v1009_v0  ;;  %v1016_v3 = vld [vmem:[#allocation8 + $0x30] sm:$0xff]  ;;  %v1007_v4 = vld [vmem:[#allocation5 + $0x8] sm:$0xff]  ;;  %s748_s25 = scalar_lea.hbm %s1648_s9, %s1003_s14  ;;  %s430_s28 = scalar_lea.vmem [#allocation13], %s882_s21 }
  0x45   : > { %557 = vmatpush.bf16.msra.mxu1 %v1017_v1  ;;  %v1015_v5 = vld [vmem:[#allocation8 + $0x28] sm:$0xff]  ;;  %v1006_v6 = vld [vmem:[#allocation5] sm:$0xff]  ;;  %v1012_v11 = vld [vmem:[#allocation8 + $0x10] sm:$0xff]  ;;  %s750_s22 = sshll.u32 %s430_s28, 4  ;;  %s738_s16 = scalar_lea.sflag [#allocation4], %s1571_s13  ;;  %s751_s22 = int_to_ptr.vmem [resolvable:$true] %s750_s22 }
  0x46   : > { %v432_v7 = vld [vmem:[%s370_s2] sm:$0xff]  ;;  %v1014_v8 = vld [vmem:[#allocation8 + $0x20] sm:$0xff]  ;;  %v1133_v20 = vld [vmem:[#allocation7] ss:$0 sm:$0xff]  ;;  %s752_s2 = sshll.u32 %s748_s25, 4  ;;  %s1337_s21 = scalar_lea.hbm %s1648_s9, 16  ;;  %s753_s2 = int_to_ptr.hbm [resolvable:$true] %s752_s2 }
  0x47   : > { %v433_v9 = vpack.c.bf16 %v432_v7, %v432_v7  ;;  %v1013_v10 = vld [vmem:[#allocation8 + $0x18] sm:$0xff]  ;;  %v1011_v12 = vld [vmem:[#allocation8 + $0x8] sm:$0xff]  ;;  %v1010_v13 = vld [vmem:[#allocation8] sm:$0xff]  ;;  %s1331_s1 = sshra.s32 %s753_s2, 4  ;;  %s1332_s1 = int_to_ptr.hbm [resolvable:$true] %s1331_s1 }
  0x48   : > { %479 = vmatpush.bf16.msra.mxu0 %v1008_v2  ;;  %v1025_v14 = vld [vmem:[#allocation10 + $0x38] sm:$0xff]  ;;  %v1024_v15 = vld [vmem:[#allocation10 + $0x30] sm:$0xff]  ;;  %v1023_v16 = vld [vmem:[#allocation10 + $0x28] sm:$0xff]  ;;  %s1333_s3 = scalar_lea.hbm %s1332_s1, 8  ;;  %p1338_p12 = scmp.lt.s32.totalorder %s1332_s1, %s1648_s9 }
  0x49   : > { %558 = vmatpush.bf16.msra.mxu1 %v1016_v3  ;;  %640 = vmatpush.bf16.msra.mxu2 %v1025_v14  ;;  %v1022_v17 = vld [vmem:[#allocation10 + $0x20] sm:$0xff]  ;;  %v1021_v18 = vld [vmem:[#allocation10 + $0x18] sm:$0xff]  ;;  %v1020_v19 = vld [vmem:[#allocation10 + $0x10] sm:$0xff]  ;;  %p1334_p1 = scmp.ne.s32.totalorder %s1332_s1, %s1333_s3  ;;  %p1339_p8 = scmp.lt.s32.totalorder %s1337_s21, %s1333_s3 }
  0x4a   : > { %v1019_v26 = vld [vmem:[#allocation10 + $0x8] sm:$0xff]  ;;  %v1018_v27 = vld [vmem:[#allocation10] sm:$0xff]  ;;  %v1033_v28 = vld [vmem:[#allocation11 + $0x38] sm:$0xff] }
  0x4b   : > { %723 = vmatpush.bf16.msra.mxu3 %v1033_v28  ;;  %v1032_v29 = vld [vmem:[#allocation11 + $0x30] sm:$0xff]  ;;  %v1031_v30 = vld [vmem:[#allocation11 + $0x28] sm:$0xff]  ;;  %v1030_v31 = vld [vmem:[#allocation11 + $0x20] sm:$0xff]  ;;  %p1335_p3 = pnand %p1334_p1, %p1540_p13  ;;  %p1340_p7 = por %p1339_p8, %p1338_p12 }
  0x4c   : > { %480 = vmatpush.bf16.msra.mxu0 %v1007_v4  ;;  %v1029_v32 = vld [vmem:[#allocation11 + $0x18] sm:$0xff]  ;;  %v1028_v33 = vld [vmem:[#allocation11 + $0x10] sm:$0xff]  ;;  %v1134_v34 = vld [vmem:[%s1643_s4] ss:$0 sm:$0xff] }
  0x4d   : > { %559 = vmatpush.bf16.msra.mxu1 %v1015_v5  ;;  %641 = vmatpush.bf16.msra.mxu2 %v1024_v15  ;;  %v1027_v40 = vld [vmem:[#allocation11 + $0x8] sm:$0xff]  ;;  %v1026_v41 = vld [vmem:[#allocation11] sm:$0xff]  ;;  %p1336_p5 = pneg %p1335_p3 }
  0x4e   : > { %v1135_v42 = vld [vmem:[%s1645_s6] ss:$0 sm:$0xff] }
  0x4f   : > { %724 = vmatpush.bf16.msra.mxu3 %v1032_v29  ;;  %v1136_v48 = vld [vmem:[%s1647_s8] ss:$0 sm:$0xff]  ;;  %p1341_p9 = pnand %p1340_p7, %p1336_p5 }
  0x50   : > { %481 = vmatpush.bf16.msra.mxu0 %v1006_v6 }
  0x51   : > { %560 = vmatpush.bf16.msra.mxu1 %v1014_v8  ;;  %642 = vmatpush.bf16.msra.mxu2 %v1023_v16 }
  0x53   : > { %905 = vmatmul.msk.bf16.vlgmr.msra.gmra.mxu0 %vm470_vm0, %v433_v9  ;;  %725 = vmatpush.bf16.msra.mxu3 %v1031_v30 }
  0x55   : > { %561 = vmatpush.bf16.msra.mxu1 %v1013_v10  ;;  %643 = vmatpush.bf16.msra.mxu2 %v1022_v17 }
  0x57   : > { %726 = vmatpush.bf16.msra.mxu3 %v1030_v31 }
  0x59   : > { %562 = vmatpush.bf16.msra.mxu1 %v1012_v11  ;;  %644 = vmatpush.bf16.msra.mxu2 %v1021_v18 }
  0x5b   : > { %727 = vmatpush.bf16.msra.mxu3 %v1029_v32 }
  0x5d   : > { %563 = vmatpush.bf16.msra.mxu1 %v1011_v12  ;;  %645 = vmatpush.bf16.msra.mxu2 %v1020_v19 }
  0x5f   : > { %728 = vmatpush.bf16.msra.mxu3 %v1028_v33 }
  0x61   : > { %564 = vmatpush.bf16.msra.mxu1 %v1010_v13  ;;  %646 = vmatpush.bf16.msra.mxu2 %v1019_v26 }
  0x63   : > { %729 = vmatpush.bf16.msra.mxu3 %v1027_v40 }
  0x65   : > { %647 = vmatpush.bf16.msra.mxu2 %v1018_v27 }
  0x67   : > { %730 = vmatpush.bf16.msra.mxu3 %v1026_v41 }
  0xd0   : > { %v483_v21 = vpop.f32.mrf.mxu0 }
  0xd1   : > { %v484_v22 = vadd.f32 %v1133_v20, %v483_v21 }
  0xd3   : > { %v487_v23 = vmax.f32 %v484_v22, 0.0 }
  0xd5   : > { %v488_v24 = vpack.c.bf16 %v487_v23, %v487_v23 }
  0xd7   : > { %565 = vmatmul.bf16.vlgmr.msra.gmra.mxu1 %v488_v24 }
  0xd8   : > { %v485_v25 = vpop.f32.mrf.mxu0 }
 0x154   : > { %v566_v35 = vpop.f32.mrf.mxu1 }
 0x155   : > { %v567_v36 = vadd.f32 %v1134_v34, %v566_v35 }
 0x157   : > { %v570_v37 = vmax.f32 %v567_v36, 0.0 }
 0x159   : > { %v571_v38 = vpack.c.bf16 %v570_v37, %v570_v37 }
 0x15b   : > { %648 = vmatmul.bf16.vlgmr.msra.gmra.mxu2 %v571_v38 }
 0x15c   : > { %v568_v39 = vpop.f32.mrf.mxu1 }
 0x1de   : > { %v649_v43 = vpop.f32.mrf.mxu2 }
 0x1df   : > { %v650_v44 = vadd.f32 %v1135_v42, %v649_v43 }
 0x1e1   : > { %v653_v45 = vmax.f32 %v650_v44, 0.0 }
 0x1e3   : > { %v654_v46 = vpack.c.bf16 %v653_v45, %v653_v45 }
 0x1e5   : > { %731 = vmatmul.bf16.vlgmr.msra.gmra.mxu3 %v654_v46 }
 0x1e6   : > { %v651_v47 = vpop.f32.mrf.mxu2 }
 0x268   : > { %v732_v49 = vpop.f32.mrf.mxu3 }
 0x269   : > { %v733_v50 = vadd.f32 %v1136_v48, %v732_v49 }
 0x26b   : > { %736 = vst.msk [vmem:[%s430_s28] sm:$0xff] %vm470_vm0, %v733_v50 }
 0x26c   : > { %1344 = shalt.err (!%p1341_p9)
}
 0x26d   : > { %1056 = dma.vmem_to_hbm [thread:$0]  (%p1540_p13), %s751_s22, 128, %s753_s2, %s738_s16  }
 0x270   : > { %v734_v51 = vpop.f32.mrf.mxu3 }
 0x271 PF: > { %s764_s13 = sand.u32 1, %s1383_s30   ;;  %p1661_p10 = scmp.ge.s32.totalorder %s1395_s12, 2 }
 0x272   : > { %s765_s26 = scalar_lea.sflag [#allocation4], %s764_s13 }
 0x273   : > { %p1079_p11 = pnand %p1661_p10, %p1545_p4 }
 0x275   : > { %p1080_p0 = pneg %p1079_p11 }
 0x277   : > { %1378 = dma.done.wait (%p1080_p0), %s765_s26, 128  }
 0x278   : > { %1380 = vsyncadd (%p1080_p0), %s765_s26, 4294967168  ;;  %p25_p2 = scmp.ge.s32.totalorder %s1520_s18, 4   ;;  %s1662_s30 = smov %s1387_s10 }
 0x279   : > { %s1663_s10 = smov %s1391_s11  ;;  %s1664_s11 = smov %s1532_s20 }
 0x27a   : > { %s1665_s12 = smov %s1520_s18  ;;  %27 = sbr.rel (!%p25_p2) target bundleno = 12 (0xc), region = 121 }
 0x27f   :  { %771 = vsyncpa [#allocation3], 1 }
 0x280   :  { %773 = vsyncpa [#allocation3 + $0x1], 1 }
 0x281   :  { %774 = vsyncpa [#allocation6], 1 }
 0x282   :  { %775 = vsyncpa [#allocation9], 1 }
 0x283   :  { %776 = vsyncpa [#allocation12], 1 }
 0x284   :  { %777 = vsyncpa [#allocation4], 1 }
 0x285   :  { %779 = vsyncpa [#allocation4 + $0x1], 1 }

</bundles_post_ra>
